<compile_context>
chip_gen: v7x
topology: tpu7x:2x2x1
jax: 0.10.0
libtpu: 0.0.40
codegen_flags: <defaults>
</compile_context>

<pallas_src>
import functools

import jax
import jax.numpy as jnp
from jax import lax
from jax.experimental import pallas as pl
from jax.experimental.pallas import tpu as pltpu


# ---------------------------------------------------------------------------
# Fused Pallas kernel: entire GraphTemporalEmbedding forward in one grid step
# ---------------------------------------------------------------------------
def _gte_fused_kernel(x_ref, w1_ref, b1_ref, w2_ref, b2_ref, wbd_ref, gbt_ref,
                      adj_ref, out_ref, *, num_levels, K, L, BL, dilations):
    NP, LANES = out_ref.shape
    x = x_ref[...]                        # (NP, LANES) activation, vreg/VMEM-resident throughout
    wbd = wbd_ref[...]                    # (LANES, LANES) block-diagonal GCN weight (hoisted)
    gbt = gbt_ref[...]                    # (NP, LANES)  pre-tiled GCN bias (hoisted)

    # hoisted lane bookkeeping for the tap masks (computed once, reused by every tap)
    lane = lax.broadcasted_iota(jnp.int32, (NP, LANES), 1)
    t = lane % L                          # time index inside each batch block
    valid = lane < BL                     # real (non-padded) lanes

    def conv_relu(h, lvl, w_ref, b_ref, dil):
        # Dilated 'same' Conv1d on the batch-folded (channels, B*L) layout, fully
        # vreg-resident: per tap, an XLU lane roll + VPU mask + one (8,8)@(8,128) MXU dot.
        pad = (K - 1) * dil // 2
        acc = b_ref[lvl]                  # pre-tiled bias slab: plain load, no broadcast
        for k in range(K):                # static unroll over taps
            off = k * dil - pad
            if off == 0:
                tap = h
            else:
                rolled = pltpu.roll(h, shift=(-off) % LANES, axis=1)   # tap[p] = h[p + off]
                m = valid & (t >= -off) & (t < L - off)                # zero 'same' padding
                tap = jnp.where(m, rolled, 0.0)
            acc = acc + jnp.dot(w_ref[lvl * K + k], tap,
                                preferred_element_type=jnp.float32)
        return jnp.maximum(acc, 0.0)

    for lvl in range(num_levels):         # all levels fused: no HBM round-trips
        d = dilations[lvl]
        h = conv_relu(x, lvl, w1_ref, b1_ref, d)
        h = conv_relu(h, lvl, w2_ref, b2_ref, d)
        x = jnp.maximum(h + x, 0.0)       # TemporalBlock residual + ReLU
        if lvl >= 1:                      # AdaGCN on levels 1..num_levels-1
            xw = jnp.dot(x, wbd, preferred_element_type=jnp.float32)          # X @ W (batched)
            x = jnp.dot(adj_ref[lvl - 1], xw,
                        preferred_element_type=jnp.float32) + gbt             # A @ (XW) + b
    out_ref[...] = x


# ---------------------------------------------------------------------------
# One-time host-side parameter prep (amortized across forwards)
# ---------------------------------------------------------------------------
def prepare_gte_params(params, num_levels, B, L):
    tcs = params["tc"][:num_levels]
    N = tcs[0]["w1"].shape[0]
    K = tcs[0]["w1"].shape[-1]
    NP = ((N + 7) // 8) * 8                       # sublane-aligned channel dim
    BL = B * L
    LANES = max(128, ((BL + 127) // 128) * 128)   # lane-dense batch-folded time dim

    def pad_nn(w):                                # (N,N) -> (NP,NP), zero padded
        return jnp.zeros((NP, NP), jnp.float32).at[:N, :N].set(w.astype(jnp.float32))

    def bias_slab(b):                             # (N,) -> (NP,LANES) pre-tiled bias
        slab = jnp.zeros((NP, LANES), jnp.float32)
        return slab.at[:N, :BL].set(jnp.broadcast_to(b.astype(jnp.float32)[:, None], (N, BL)))

    w1 = jnp.stack([pad_nn(p["w1"][:, :, k]) for p in tcs for k in range(K)])  # (nl*K,NP,NP)
    w2 = jnp.stack([pad_nn(p["w2"][:, :, k]) for p in tcs for k in range(K)])
    b1 = jnp.stack([bias_slab(p["b1"]) for p in tcs])                          # (nl,NP,LANES)
    b2 = jnp.stack([bias_slab(p["b2"]) for p in tcs])

    # Block-diagonal GCN weight kron(I_B, W), zero-padded to the lane-dense slab.
    # TODO(synk): at large B*L switch to a per-batch (N,L)@(L,L) loop (kron is B^2*L^2).
    W = params["gcn"]["weight"].astype(jnp.float32)
    wbd = jnp.zeros((LANES, LANES), jnp.float32).at[:BL, :BL].set(
        jnp.kron(jnp.eye(B, dtype=jnp.float32), W))
    gb = params["gcn"]["bias"].astype(jnp.float32)
    gbt = jnp.zeros((NP, LANES), jnp.float32).at[:N, :BL].set(
        jnp.broadcast_to(jnp.tile(gb, B)[None, :], (N, BL)))

    return {"w1": w1, "w2": w2, "b1": b1, "b2": b2,
            "wbd": wbd, "gbt": gbt, "logits": params["gcn"]["logits"]}


def graph_temporal_embedding(x, prep, num_levels, rng_key):
    """x: (B, seq_len, N) -> (B, seq_len, N), matching GraphTemporalEmbedding.forward."""
    x = x.astype(jnp.float32)
    B, L, N = x.shape
    BL = B * L
    NP = prep["w1"].shape[-1]
    LANES = prep["wbd"].shape[-1]
    K = prep["w1"].shape[0] // num_levels

    # batch-folded, (8,128)-aligned activation slab: row = node channel, lane = b*L + t
    x_mat = jnp.transpose(x, (2, 0, 1)).reshape(N, BL)
    x_pad = jnp.zeros((NP, LANES), jnp.float32).at[:N, :BL].set(x_mat)

    # Per-level gumbel-gated adjacency.  gcn_norm on the fully-connected edge list gives
    # deg == N for every node (degrees use the UNgated edge weights), so norm == 1/N; the
    # hard gumbel gate z0 then multiplies each (target i, source j) message.
    if num_levels > 1:
        idx = jnp.arange(1, num_levels)
        keys = jax.vmap(lambda i: jax.random.fold_in(rng_key, i))(idx)
        z0 = jax.vmap(lambda k: gumbel_hard_z0(k, prep["logits"]))(keys)       # (nl-1, N*N)
        adj = jnp.zeros((num_levels - 1, NP, NP), jnp.float32).at[:, :N, :N].set(
            z0.reshape(num_levels - 1, N, N) / N)
    else:
        adj = jnp.zeros((1, NP, NP), jnp.float32)                              # never read

    kernel = functools.partial(
        _gte_fused_kernel, num_levels=num_levels, K=K, L=L, BL=BL,
        dilations=tuple(2 ** i for i in range(num_levels)))

    def full(shape):  # whole-array block, single grid step
        return pl.BlockSpec(shape, lambda *_: (0,) * len(shape))

    args = (x_pad, prep["w1"], prep["b1"], prep["w2"], prep["b2"],
            prep["wbd"], prep["gbt"], adj)
    out_mat = pl.pallas_call(
        kernel,
        out_shape=jax.ShapeDtypeStruct((NP, LANES), jnp.float32),
        grid=(1,),
        in_specs=[full(a.shape) for a in args],
        out_specs=full((NP, LANES)),
        compiler_params=pltpu.CompilerParams(dimension_semantics=("arbitrary",)),
    )(*args)

    # drop the zero padding and restore (B, L, N)
    return out_mat[:N, :BL].reshape(N, B, L).transpose(1, 2, 0)


# ---------------------------------------------------------------------------
# Model glue (pure JAX): gumbel gate, forward, params
# ---------------------------------------------------------------------------
def gumbel_hard_z0(key, logits, tau=1.0):
    """Forward value of torch.nn.functional.gumbel_softmax(logits, hard=True)[:, 0]."""
    # TODO(synk): straight-through gradient of gumbel_softmax(hard=True) is not implemented
    # (forward pass only).
    u = jax.random.uniform(key, logits.shape, minval=1e-20, maxval=1.0)
    g = -jnp.log(-jnp.log(u))
    y = (logits + g) / tau
    return (jnp.argmax(y, axis=-1) == 0).astype(jnp.float32)


def gta_forward(prep, batch_x, batch_y, batch_x_mark, batch_y_mark,
                *, label_len, out_len, num_levels, rng_key):
    # TODO(synk): exact TemporalBlock internals are not given in the spec; implemented as two
    # dilated same-padding Conv1d + ReLU layers with an identity residual and final ReLU
    # (dropout=0.0 -> identity), matching the previously accepted version.
    emb = graph_temporal_embedding(batch_x, prep, num_levels, rng_key)
    dec_zeros = jnp.zeros_like(batch_y[:, -out_len:, :])
    dec_inp = jnp.concatenate([batch_y[:, :label_len, :], dec_zeros], axis=1)
    # TODO(synk): the Informer encoder/decoder (self.model) is not provided in the reference
    # code; returning the graph-temporal embedding and the decoder input instead.
    return emb, dec_inp


def init_params(key, num_nodes, seq_len, num_levels, kernel_size=3):
    keys = jax.random.split(key, 2 * num_levels + 1)
    tc = []
    scale = 1.0 / (num_nodes * kernel_size) ** 0.5       # PyTorch Conv1d default bound
    for i in range(num_levels):
        tc.append({
            "w1": jax.random.uniform(keys[2 * i], (num_nodes, num_nodes, kernel_size),
                                     minval=-scale, maxval=scale, dtype=jnp.float32),
            "b1": jnp.zeros((num_nodes,), jnp.float32),
            "w2": jax.random.uniform(keys[2 * i + 1], (num_nodes, num_nodes, kernel_size),
                                     minval=-scale, maxval=scale, dtype=jnp.float32),
            "b2": jnp.zeros((num_nodes,), jnp.float32),
        })
    limit = (6.0 / (seq_len + seq_len)) ** 0.5           # glorot
    gcn = {
        "weight": jax.random.uniform(keys[-1], (seq_len, seq_len),
                                     minval=-limit, maxval=limit, dtype=jnp.float32),
        "bias": jnp.zeros((seq_len,), jnp.float32),      # zeros(bias)
        # init_method='all': logits[:, 0] = 0.8, logits[:, 1] = 0
        "logits": jnp.concatenate(
            [0.8 * jnp.ones((num_nodes ** 2, 1), jnp.float32),
             jnp.zeros((num_nodes ** 2, 1), jnp.float32)], axis=1),
    }
    return {"tc": tc, "gcn": gcn}


# ---------------------------------------------------------------------------
# Pure-JAX reference (used only for a correctness self-check)
# ---------------------------------------------------------------------------
def _graph_temporal_embedding_ref(x, params, num_levels, rng_key):
    prec = lax.Precision.HIGHEST
    xb = jnp.transpose(x, (0, 2, 1)).astype(jnp.float32)      # (B, N, L)
    _, N, L = xb.shape
    W, gb = params["gcn"]["weight"], params["gcn"]["bias"]

    def conv(h, w, b, d):
        kk = w.shape[-1]
        pad = (kk - 1) * d // 2
        hp = jnp.pad(h, ((0, 0), (0, 0), (pad, pad)))
        out = b[None, :, None]
        for k in range(kk):
            out = out + jnp.einsum("oc,bcl->bol", w[:, :, k],
                                   hp[:, :, k * d:k * d + L], precision=prec)
        return out

    for lvl in range(num_levels):
        d = 2 ** lvl
        p = params["tc"][lvl]
        h = jax.nn.relu(conv(xb, p["w1"], p["b1"], d))
        h = jax.nn.relu(conv(h, p["w2"], p["b2"], d))
        xb = jax.nn.relu(h + xb)
        if lvl >= 1:
            z0 = gumbel_hard_z0(jax.random.fold_in(rng_key, lvl), params["gcn"]["logits"])
            adj = z0.reshape(N, N) / N
            xw = jnp.einsum("bnl,lm->bnm", xb, W, precision=prec)
            xb = jnp.einsum("ij,bjl->bil", adj, xw, precision=prec) + gb[None, None, :]
    return jnp.transpose(xb, (0, 2, 1))                        # (B, L, N)


if __name__ == "__main__":
    B, N, L = 2, 4, 16                        # batch, num_nodes, seq_len
    label_len, out_len, num_levels = 8, 8, 3
    key = jax.random.PRNGKey(0)
    kp, kx, ky, kxm, kym, kg = jax.random.split(key, 6)

    params = init_params(kp, N, L, num_levels)
    prep = prepare_gte_params(params, num_levels, B, L)        # one-time layout prep
    batch_x = jax.random.normal(kx, (B, L, N), jnp.float32)
    batch_y = jax.random.normal(ky, (B, label_len + out_len, N), jnp.float32)
    batch_x_mark = jax.random.normal(kxm, (B, L, 4), jnp.float32)
    batch_y_mark = jax.random.normal(kym, (B, label_len + out_len, 4), jnp.float32)

    fwd = jax.jit(functools.partial(gta_forward, label_len=label_len,
                                    out_len=out_len, num_levels=num_levels))
    emb, dec_inp = fwd(prep, batch_x, batch_y, batch_x_mark, batch_y_mark, rng_key=kg)
    jax.block_until_ready((emb, dec_inp))

    assert emb.shape == (B, L, N)
    assert dec_inp.shape == (B, label_len + out_len, N)

    # correctness self-check vs. pure-JAX reference (same rng keys -> identical gated adjacency)
    emb_ref = _graph_temporal_embedding_ref(batch_x, params, num_levels, kg)
    err = float(jnp.max(jnp.abs(emb - emb_ref)))
    assert err < 5e-2, f"kernel/reference mismatch: max abs err = {err}"

    print("KERNEL_OK")
</pallas_src>

<mosaic_0001>
module attributes {stable_mosaic.version = 11 : i64} {
  func.func @_gte_fused_kernel(%arg0: i32, %arg1: memref<8x128xf32, #tpu.memory_space<vmem>>, %arg2: memref<9x8x8xf32, #tpu.memory_space<vmem>>, %arg3: memref<3x8x128xf32, #tpu.memory_space<vmem>>, %arg4: memref<9x8x8xf32, #tpu.memory_space<vmem>>, %arg5: memref<3x8x128xf32, #tpu.memory_space<vmem>>, %arg6: memref<128x128xf32, #tpu.memory_space<vmem>>, %arg7: memref<8x128xf32, #tpu.memory_space<vmem>>, %arg8: memref<2x8x8xf32, #tpu.memory_space<vmem>>, %arg9: memref<8x128xf32, #tpu.memory_space<vmem>>) attributes {dimension_semantics = [#tpu.dimension_semantics<arbitrary>], iteration_bounds = array<i64: 1>, scalar_prefetch = 0 : i64, scratch_operands = 0 : i64, tpu.core_type = #tpu.core_type<tc>, window_params = [{pipeline_mode = #tpu.pipeline_mode<synchronous>, transform_indices = @transform_0, window_bounds = array<i64: 8, 128>}, {pipeline_mode = #tpu.pipeline_mode<synchronous>, transform_indices = @transform_1, window_bounds = array<i64: 9, 8, 8>}, {pipeline_mode = #tpu.pipeline_mode<synchronous>, transform_indices = @transform_2, window_bounds = array<i64: 3, 8, 128>}, {pipeline_mode = #tpu.pipeline_mode<synchronous>, transform_indices = @transform_3, window_bounds = array<i64: 9, 8, 8>}, {pipeline_mode = #tpu.pipeline_mode<synchronous>, transform_indices = @transform_4, window_bounds = array<i64: 3, 8, 128>}, {pipeline_mode = #tpu.pipeline_mode<synchronous>, transform_indices = @transform_5, window_bounds = array<i64: 128, 128>}, {pipeline_mode = #tpu.pipeline_mode<synchronous>, transform_indices = @transform_6, window_bounds = array<i64: 8, 128>}, {pipeline_mode = #tpu.pipeline_mode<synchronous>, transform_indices = @transform_7, window_bounds = array<i64: 2, 8, 8>}, {pipeline_mode = #tpu.pipeline_mode<synchronous>, transform_indices = @transform_8, window_bounds = array<i64: 8, 128>}]} {
    %c0 = arith.constant 0 : index
    %c0_0 = arith.constant 0 : index
    %0 = vector.load %arg1[%c0, %c0_0] : memref<8x128xf32, #tpu.memory_space<vmem>>, vector<8x128xf32>
    %c0_1 = arith.constant 0 : index
    %c0_2 = arith.constant 0 : index
    %1 = vector.load %arg6[%c0_1, %c0_2] : memref<128x128xf32, #tpu.memory_space<vmem>>, vector<128x128xf32>
    %c0_3 = arith.constant 0 : index
    %c0_4 = arith.constant 0 : index
    %2 = vector.load %arg7[%c0_3, %c0_4] : memref<8x128xf32, #tpu.memory_space<vmem>>, vector<8x128xf32>
    %3 = tpu.iota {dimensions = array<i32: 1>} : vector<8x128xi32>
    %c16_i32 = arith.constant 16 : i32
    %c0_i32 = arith.constant 0 : i32
    %4 = arith.cmpi eq, %c16_i32, %c0_i32 : i32
    %c1_i32 = arith.constant 1 : i32
    %5 = arith.select %4, %c1_i32, %c16_i32 : i32
    %6 = vector.broadcast %5 : i32 to vector<8x128xi32>
    %7 = arith.remsi %3, %6 : vector<8x128xi32>
    %c0_i32_5 = arith.constant 0 : i32
    %8 = vector.broadcast %c0_i32_5 : i32 to vector<8x128xi32>
    %9 = arith.cmpi ne, %7, %8 : vector<8x128xi32>
    %c0_i32_6 = arith.constant 0 : i32
    %10 = vector.broadcast %c0_i32_6 : i32 to vector<8x128xi32>
    %11 = arith.cmpi slt, %7, %10 : vector<8x128xi32>
    %c0_i32_7 = arith.constant 0 : i32
    %12 = arith.cmpi slt, %5, %c0_i32_7 : i32
    %13 = vector.broadcast %12 : i1 to vector<8x128xi1>
    %14 = vector.broadcast %13 : vector<8x128xi1> to vector<8x128xi1>
    %15 = arith.xori %11, %14 : vector<8x128xi1>
    %16 = arith.andi %15, %9 : vector<8x128xi1>
    %17 = vector.broadcast %5 : i32 to vector<8x128xi32>
    %18 = arith.addi %7, %17 : vector<8x128xi32>
    %19 = arith.select %16, %18, %7 : vector<8x128xi1>, vector<8x128xi32>
    %c32_i32 = arith.constant 32 : i32
    %20 = vector.broadcast %c32_i32 : i32 to vector<8x128xi32>
    %21 = arith.cmpi slt, %3, %20 : vector<8x128xi32>
    %c0_8 = arith.constant 0 : index
    %c0_9 = arith.constant 0 : index
    %c0_10 = arith.constant 0 : index
    %22 = vector.load %arg3[%c0_8, %c0_9, %c0_10] : memref<3x8x128xf32, #tpu.memory_space<vmem>>, vector<1x8x128xf32>
    %23 = vector.shape_cast %22 : vector<1x8x128xf32> to vector<8x128xf32>
    %c1_i32_11 = arith.constant 1 : i32
    %24 = tpu.dynamic_rotate %0 by %c1_i32_11 dim 1 : vector<8x128xf32>, i32 -> vector<8x128xf32>
    %c1_i32_12 = arith.constant 1 : i32
    %25 = vector.broadcast %c1_i32_12 : i32 to vector<8x128xi32>
    %26 = arith.cmpi sge, %19, %25 : vector<8x128xi32>
    %27 = arith.andi %21, %26 : vector<8x128xi1>
    %c17_i32 = arith.constant 17 : i32
    %28 = vector.broadcast %c17_i32 : i32 to vector<8x128xi32>
    %29 = arith.cmpi slt, %19, %28 : vector<8x128xi32>
    %30 = arith.andi %27, %29 : vector<8x128xi1>
    %cst = arith.constant 0.000000e+00 : f32
    %31 = vector.broadcast %cst : f32 to vector<8x128xf32>
    %32 = arith.select %30, %24, %31 : vector<8x128xi1>, vector<8x128xf32>
    %c0_13 = arith.constant 0 : index
    %c0_14 = arith.constant 0 : index
    %c0_15 = arith.constant 0 : index
    %33 = vector.load %arg2[%c0_13, %c0_14, %c0_15] : memref<9x8x8xf32, #tpu.memory_space<vmem>>, vector<1x8x8xf32>
    %34 = vector.shape_cast %33 : vector<1x8x8xf32> to vector<8x8xf32>
    %cst_16 = arith.constant dense<0.000000e+00> : vector<8x128xf32>
    %35 = tpu.matmul %34, %32, %cst_16 {dimension_numbers = #tpu.dot_dimension_numbers<[1], [0], [0], [1], [0, 0, 1, 1], [], []>} : vector<8x8xf32>, vector<8x128xf32>, vector<8x128xf32> -> vector<8x128xf32>
    %36 = arith.addf %23, %35 : vector<8x128xf32>
    %c1 = arith.constant 1 : index
    %c0_17 = arith.constant 0 : index
    %c0_18 = arith.constant 0 : index
    %37 = vector.load %arg2[%c1, %c0_17, %c0_18] : memref<9x8x8xf32, #tpu.memory_space<vmem>>, vector<1x8x8xf32>
    %38 = vector.shape_cast %37 : vector<1x8x8xf32> to vector<8x8xf32>
    %cst_19 = arith.constant dense<0.000000e+00> : vector<8x128xf32>
    %39 = tpu.matmul %38, %0, %cst_19 {dimension_numbers = #tpu.dot_dimension_numbers<[1], [0], [0], [1], [0, 0, 1, 1], [], []>} : vector<8x8xf32>, vector<8x128xf32>, vector<8x128xf32> -> vector<8x128xf32>
    %40 = arith.addf %36, %39 : vector<8x128xf32>
    %c127_i32 = arith.constant 127 : i32
    %41 = tpu.dynamic_rotate %0 by %c127_i32 dim 1 : vector<8x128xf32>, i32 -> vector<8x128xf32>
    %c-1_i32 = arith.constant -1 : i32
    %42 = vector.broadcast %c-1_i32 : i32 to vector<8x128xi32>
    %43 = arith.cmpi sge, %19, %42 : vector<8x128xi32>
    %44 = arith.andi %21, %43 : vector<8x128xi1>
    %c15_i32 = arith.constant 15 : i32
    %45 = vector.broadcast %c15_i32 : i32 to vector<8x128xi32>
    %46 = arith.cmpi slt, %19, %45 : vector<8x128xi32>
    %47 = arith.andi %44, %46 : vector<8x128xi1>
    %cst_20 = arith.constant 0.000000e+00 : f32
    %48 = vector.broadcast %cst_20 : f32 to vector<8x128xf32>
    %49 = arith.select %47, %41, %48 : vector<8x128xi1>, vector<8x128xf32>
    %c2 = arith.constant 2 : index
    %c0_21 = arith.constant 0 : index
    %c0_22 = arith.constant 0 : index
    %50 = vector.load %arg2[%c2, %c0_21, %c0_22] : memref<9x8x8xf32, #tpu.memory_space<vmem>>, vector<1x8x8xf32>
    %51 = vector.shape_cast %50 : vector<1x8x8xf32> to vector<8x8xf32>
    %cst_23 = arith.constant dense<0.000000e+00> : vector<8x128xf32>
    %52 = tpu.matmul %51, %49, %cst_23 {dimension_numbers = #tpu.dot_dimension_numbers<[1], [0], [0], [1], [0, 0, 1, 1], [], []>} : vector<8x8xf32>, vector<8x128xf32>, vector<8x128xf32> -> vector<8x128xf32>
    %53 = arith.addf %40, %52 : vector<8x128xf32>
    %cst_24 = arith.constant 0.000000e+00 : f32
    %54 = vector.broadcast %cst_24 : f32 to vector<8x128xf32>
    %55 = arith.maximumf %53, %54 : vector<8x128xf32>
    %c0_25 = arith.constant 0 : index
    %c0_26 = arith.constant 0 : index
    %c0_27 = arith.constant 0 : index
    %56 = vector.load %arg5[%c0_25, %c0_26, %c0_27] : memref<3x8x128xf32, #tpu.memory_space<vmem>>, vector<1x8x128xf32>
    %57 = vector.shape_cast %56 : vector<1x8x128xf32> to vector<8x128xf32>
    %c1_i32_28 = arith.constant 1 : i32
    %58 = tpu.dynamic_rotate %55 by %c1_i32_28 dim 1 : vector<8x128xf32>, i32 -> vector<8x128xf32>
    %c1_i32_29 = arith.constant 1 : i32
    %59 = vector.broadcast %c1_i32_29 : i32 to vector<8x128xi32>
    %60 = arith.cmpi sge, %19, %59 : vector<8x128xi32>
    %61 = arith.andi %21, %60 : vector<8x128xi1>
    %c17_i32_30 = arith.constant 17 : i32
    %62 = vector.broadcast %c17_i32_30 : i32 to vector<8x128xi32>
    %63 = arith.cmpi slt, %19, %62 : vector<8x128xi32>
    %64 = arith.andi %61, %63 : vector<8x128xi1>
    %cst_31 = arith.constant 0.000000e+00 : f32
    %65 = vector.broadcast %cst_31 : f32 to vector<8x128xf32>
    %66 = arith.select %64, %58, %65 : vector<8x128xi1>, vector<8x128xf32>
    %c0_32 = arith.constant 0 : index
    %c0_33 = arith.constant 0 : index
    %c0_34 = arith.constant 0 : index
    %67 = vector.load %arg4[%c0_32, %c0_33, %c0_34] : memref<9x8x8xf32, #tpu.memory_space<vmem>>, vector<1x8x8xf32>
    %68 = vector.shape_cast %67 : vector<1x8x8xf32> to vector<8x8xf32>
    %cst_35 = arith.constant dense<0.000000e+00> : vector<8x128xf32>
    %69 = tpu.matmul %68, %66, %cst_35 {dimension_numbers = #tpu.dot_dimension_numbers<[1], [0], [0], [1], [0, 0, 1, 1], [], []>} : vector<8x8xf32>, vector<8x128xf32>, vector<8x128xf32> -> vector<8x128xf32>
    %70 = arith.addf %57, %69 : vector<8x128xf32>
    %c1_36 = arith.constant 1 : index
    %c0_37 = arith.constant 0 : index
    %c0_38 = arith.constant 0 : index
    %71 = vector.load %arg4[%c1_36, %c0_37, %c0_38] : memref<9x8x8xf32, #tpu.memory_space<vmem>>, vector<1x8x8xf32>
    %72 = vector.shape_cast %71 : vector<1x8x8xf32> to vector<8x8xf32>
    %cst_39 = arith.constant dense<0.000000e+00> : vector<8x128xf32>
    %73 = tpu.matmul %72, %55, %cst_39 {dimension_numbers = #tpu.dot_dimension_numbers<[1], [0], [0], [1], [0, 0, 1, 1], [], []>} : vector<8x8xf32>, vector<8x128xf32>, vector<8x128xf32> -> vector<8x128xf32>
    %74 = arith.addf %70, %73 : vector<8x128xf32>
    %c127_i32_40 = arith.constant 127 : i32
    %75 = tpu.dynamic_rotate %55 by %c127_i32_40 dim 1 : vector<8x128xf32>, i32 -> vector<8x128xf32>
    %c-1_i32_41 = arith.constant -1 : i32
    %76 = vector.broadcast %c-1_i32_41 : i32 to vector<8x128xi32>
    %77 = arith.cmpi sge, %19, %76 : vector<8x128xi32>
    %78 = arith.andi %21, %77 : vector<8x128xi1>
    %c15_i32_42 = arith.constant 15 : i32
    %79 = vector.broadcast %c15_i32_42 : i32 to vector<8x128xi32>
    %80 = arith.cmpi slt, %19, %79 : vector<8x128xi32>
    %81 = arith.andi %78, %80 : vector<8x128xi1>
    %cst_43 = arith.constant 0.000000e+00 : f32
    %82 = vector.broadcast %cst_43 : f32 to vector<8x128xf32>
    %83 = arith.select %81, %75, %82 : vector<8x128xi1>, vector<8x128xf32>
    %c2_44 = arith.constant 2 : index
    %c0_45 = arith.constant 0 : index
    %c0_46 = arith.constant 0 : index
    %84 = vector.load %arg4[%c2_44, %c0_45, %c0_46] : memref<9x8x8xf32, #tpu.memory_space<vmem>>, vector<1x8x8xf32>
    %85 = vector.shape_cast %84 : vector<1x8x8xf32> to vector<8x8xf32>
    %cst_47 = arith.constant dense<0.000000e+00> : vector<8x128xf32>
    %86 = tpu.matmul %85, %83, %cst_47 {dimension_numbers = #tpu.dot_dimension_numbers<[1], [0], [0], [1], [0, 0, 1, 1], [], []>} : vector<8x8xf32>, vector<8x128xf32>, vector<8x128xf32> -> vector<8x128xf32>
    %87 = arith.addf %74, %86 : vector<8x128xf32>
    %cst_48 = arith.constant 0.000000e+00 : f32
    %88 = vector.broadcast %cst_48 : f32 to vector<8x128xf32>
    %89 = arith.maximumf %87, %88 : vector<8x128xf32>
    %90 = arith.addf %89, %0 : vector<8x128xf32>
    %cst_49 = arith.constant 0.000000e+00 : f32
    %91 = vector.broadcast %cst_49 : f32 to vector<8x128xf32>
    %92 = arith.maximumf %90, %91 : vector<8x128xf32>
    %c1_50 = arith.constant 1 : index
    %c0_51 = arith.constant 0 : index
    %c0_52 = arith.constant 0 : index
    %93 = vector.load %arg3[%c1_50, %c0_51, %c0_52] : memref<3x8x128xf32, #tpu.memory_space<vmem>>, vector<1x8x128xf32>
    %94 = vector.shape_cast %93 : vector<1x8x128xf32> to vector<8x128xf32>
    %c2_i32 = arith.constant 2 : i32
    %95 = tpu.dynamic_rotate %92 by %c2_i32 dim 1 : vector<8x128xf32>, i32 -> vector<8x128xf32>
    %c2_i32_53 = arith.constant 2 : i32
    %96 = vector.broadcast %c2_i32_53 : i32 to vector<8x128xi32>
    %97 = arith.cmpi sge, %19, %96 : vector<8x128xi32>
    %98 = arith.andi %21, %97 : vector<8x128xi1>
    %c18_i32 = arith.constant 18 : i32
    %99 = vector.broadcast %c18_i32 : i32 to vector<8x128xi32>
    %100 = arith.cmpi slt, %19, %99 : vector<8x128xi32>
    %101 = arith.andi %98, %100 : vector<8x128xi1>
    %cst_54 = arith.constant 0.000000e+00 : f32
    %102 = vector.broadcast %cst_54 : f32 to vector<8x128xf32>
    %103 = arith.select %101, %95, %102 : vector<8x128xi1>, vector<8x128xf32>
    %c3 = arith.constant 3 : index
    %c0_55 = arith.constant 0 : index
    %c0_56 = arith.constant 0 : index
    %104 = vector.load %arg2[%c3, %c0_55, %c0_56] : memref<9x8x8xf32, #tpu.memory_space<vmem>>, vector<1x8x8xf32>
    %105 = vector.shape_cast %104 : vector<1x8x8xf32> to vector<8x8xf32>
    %cst_57 = arith.constant dense<0.000000e+00> : vector<8x128xf32>
    %106 = tpu.matmul %105, %103, %cst_57 {dimension_numbers = #tpu.dot_dimension_numbers<[1], [0], [0], [1], [0, 0, 1, 1], [], []>} : vector<8x8xf32>, vector<8x128xf32>, vector<8x128xf32> -> vector<8x128xf32>
    %107 = arith.addf %94, %106 : vector<8x128xf32>
    %c4 = arith.constant 4 : index
    %c0_58 = arith.constant 0 : index
    %c0_59 = arith.constant 0 : index
    %108 = vector.load %arg2[%c4, %c0_58, %c0_59] : memref<9x8x8xf32, #tpu.memory_space<vmem>>, vector<1x8x8xf32>
    %109 = vector.shape_cast %108 : vector<1x8x8xf32> to vector<8x8xf32>
    %cst_60 = arith.constant dense<0.000000e+00> : vector<8x128xf32>
    %110 = tpu.matmul %109, %92, %cst_60 {dimension_numbers = #tpu.dot_dimension_numbers<[1], [0], [0], [1], [0, 0, 1, 1], [], []>} : vector<8x8xf32>, vector<8x128xf32>, vector<8x128xf32> -> vector<8x128xf32>
    %111 = arith.addf %107, %110 : vector<8x128xf32>
    %c126_i32 = arith.constant 126 : i32
    %112 = tpu.dynamic_rotate %92 by %c126_i32 dim 1 : vector<8x128xf32>, i32 -> vector<8x128xf32>
    %c-2_i32 = arith.constant -2 : i32
    %113 = vector.broadcast %c-2_i32 : i32 to vector<8x128xi32>
    %114 = arith.cmpi sge, %19, %113 : vector<8x128xi32>
    %115 = arith.andi %21, %114 : vector<8x128xi1>
    %c14_i32 = arith.constant 14 : i32
    %116 = vector.broadcast %c14_i32 : i32 to vector<8x128xi32>
    %117 = arith.cmpi slt, %19, %116 : vector<8x128xi32>
    %118 = arith.andi %115, %117 : vector<8x128xi1>
    %cst_61 = arith.constant 0.000000e+00 : f32
    %119 = vector.broadcast %cst_61 : f32 to vector<8x128xf32>
    %120 = arith.select %118, %112, %119 : vector<8x128xi1>, vector<8x128xf32>
    %c5 = arith.constant 5 : index
    %c0_62 = arith.constant 0 : index
    %c0_63 = arith.constant 0 : index
    %121 = vector.load %arg2[%c5, %c0_62, %c0_63] : memref<9x8x8xf32, #tpu.memory_space<vmem>>, vector<1x8x8xf32>
    %122 = vector.shape_cast %121 : vector<1x8x8xf32> to vector<8x8xf32>
    %cst_64 = arith.constant dense<0.000000e+00> : vector<8x128xf32>
    %123 = tpu.matmul %122, %120, %cst_64 {dimension_numbers = #tpu.dot_dimension_numbers<[1], [0], [0], [1], [0, 0, 1, 1], [], []>} : vector<8x8xf32>, vector<8x128xf32>, vector<8x128xf32> -> vector<8x128xf32>
    %124 = arith.addf %111, %123 : vector<8x128xf32>
    %cst_65 = arith.constant 0.000000e+00 : f32
    %125 = vector.broadcast %cst_65 : f32 to vector<8x128xf32>
    %126 = arith.maximumf %124, %125 : vector<8x128xf32>
    %c1_66 = arith.constant 1 : index
    %c0_67 = arith.constant 0 : index
    %c0_68 = arith.constant 0 : index
    %127 = vector.load %arg5[%c1_66, %c0_67, %c0_68] : memref<3x8x128xf32, #tpu.memory_space<vmem>>, vector<1x8x128xf32>
    %128 = vector.shape_cast %127 : vector<1x8x128xf32> to vector<8x128xf32>
    %c2_i32_69 = arith.constant 2 : i32
    %129 = tpu.dynamic_rotate %126 by %c2_i32_69 dim 1 : vector<8x128xf32>, i32 -> vector<8x128xf32>
    %c2_i32_70 = arith.constant 2 : i32
    %130 = vector.broadcast %c2_i32_70 : i32 to vector<8x128xi32>
    %131 = arith.cmpi sge, %19, %130 : vector<8x128xi32>
    %132 = arith.andi %21, %131 : vector<8x128xi1>
    %c18_i32_71 = arith.constant 18 : i32
    %133 = vector.broadcast %c18_i32_71 : i32 to vector<8x128xi32>
    %134 = arith.cmpi slt, %19, %133 : vector<8x128xi32>
    %135 = arith.andi %132, %134 : vector<8x128xi1>
    %cst_72 = arith.constant 0.000000e+00 : f32
    %136 = vector.broadcast %cst_72 : f32 to vector<8x128xf32>
    %137 = arith.select %135, %129, %136 : vector<8x128xi1>, vector<8x128xf32>
    %c3_73 = arith.constant 3 : index
    %c0_74 = arith.constant 0 : index
    %c0_75 = arith.constant 0 : index
    %138 = vector.load %arg4[%c3_73, %c0_74, %c0_75] : memref<9x8x8xf32, #tpu.memory_space<vmem>>, vector<1x8x8xf32>
    %139 = vector.shape_cast %138 : vector<1x8x8xf32> to vector<8x8xf32>
    %cst_76 = arith.constant dense<0.000000e+00> : vector<8x128xf32>
    %140 = tpu.matmul %139, %137, %cst_76 {dimension_numbers = #tpu.dot_dimension_numbers<[1], [0], [0], [1], [0, 0, 1, 1], [], []>} : vector<8x8xf32>, vector<8x128xf32>, vector<8x128xf32> -> vector<8x128xf32>
    %141 = arith.addf %128, %140 : vector<8x128xf32>
    %c4_77 = arith.constant 4 : index
    %c0_78 = arith.constant 0 : index
    %c0_79 = arith.constant 0 : index
    %142 = vector.load %arg4[%c4_77, %c0_78, %c0_79] : memref<9x8x8xf32, #tpu.memory_space<vmem>>, vector<1x8x8xf32>
    %143 = vector.shape_cast %142 : vector<1x8x8xf32> to vector<8x8xf32>
    %cst_80 = arith.constant dense<0.000000e+00> : vector<8x128xf32>
    %144 = tpu.matmul %143, %126, %cst_80 {dimension_numbers = #tpu.dot_dimension_numbers<[1], [0], [0], [1], [0, 0, 1, 1], [], []>} : vector<8x8xf32>, vector<8x128xf32>, vector<8x128xf32> -> vector<8x128xf32>
    %145 = arith.addf %141, %144 : vector<8x128xf32>
    %c126_i32_81 = arith.constant 126 : i32
    %146 = tpu.dynamic_rotate %126 by %c126_i32_81 dim 1 : vector<8x128xf32>, i32 -> vector<8x128xf32>
    %c-2_i32_82 = arith.constant -2 : i32
    %147 = vector.broadcast %c-2_i32_82 : i32 to vector<8x128xi32>
    %148 = arith.cmpi sge, %19, %147 : vector<8x128xi32>
    %149 = arith.andi %21, %148 : vector<8x128xi1>
    %c14_i32_83 = arith.constant 14 : i32
    %150 = vector.broadcast %c14_i32_83 : i32 to vector<8x128xi32>
    %151 = arith.cmpi slt, %19, %150 : vector<8x128xi32>
    %152 = arith.andi %149, %151 : vector<8x128xi1>
    %cst_84 = arith.constant 0.000000e+00 : f32
    %153 = vector.broadcast %cst_84 : f32 to vector<8x128xf32>
    %154 = arith.select %152, %146, %153 : vector<8x128xi1>, vector<8x128xf32>
    %c5_85 = arith.constant 5 : index
    %c0_86 = arith.constant 0 : index
    %c0_87 = arith.constant 0 : index
    %155 = vector.load %arg4[%c5_85, %c0_86, %c0_87] : memref<9x8x8xf32, #tpu.memory_space<vmem>>, vector<1x8x8xf32>
    %156 = vector.shape_cast %155 : vector<1x8x8xf32> to vector<8x8xf32>
    %cst_88 = arith.constant dense<0.000000e+00> : vector<8x128xf32>
    %157 = tpu.matmul %156, %154, %cst_88 {dimension_numbers = #tpu.dot_dimension_numbers<[1], [0], [0], [1], [0, 0, 1, 1], [], []>} : vector<8x8xf32>, vector<8x128xf32>, vector<8x128xf32> -> vector<8x128xf32>
    %158 = arith.addf %145, %157 : vector<8x128xf32>
    %cst_89 = arith.constant 0.000000e+00 : f32
    %159 = vector.broadcast %cst_89 : f32 to vector<8x128xf32>
    %160 = arith.maximumf %158, %159 : vector<8x128xf32>
    %161 = arith.addf %160, %92 : vector<8x128xf32>
    %cst_90 = arith.constant 0.000000e+00 : f32
    %162 = vector.broadcast %cst_90 : f32 to vector<8x128xf32>
    %163 = arith.maximumf %161, %162 : vector<8x128xf32>
    %cst_91 = arith.constant dense<0.000000e+00> : vector<8x128xf32>
    %164 = tpu.matmul %163, %1, %cst_91 {dimension_numbers = #tpu.dot_dimension_numbers<[1], [0], [0], [1], [0, 0, 1, 1], [], []>} : vector<8x128xf32>, vector<128x128xf32>, vector<8x128xf32> -> vector<8x128xf32>
    %c0_92 = arith.constant 0 : index
    %c0_93 = arith.constant 0 : index
    %c0_94 = arith.constant 0 : index
    %165 = vector.load %arg8[%c0_92, %c0_93, %c0_94] : memref<2x8x8xf32, #tpu.memory_space<vmem>>, vector<1x8x8xf32>
    %166 = vector.shape_cast %165 : vector<1x8x8xf32> to vector<8x8xf32>
    %cst_95 = arith.constant dense<0.000000e+00> : vector<8x128xf32>
    %167 = tpu.matmul %166, %164, %cst_95 {dimension_numbers = #tpu.dot_dimension_numbers<[1], [0], [0], [1], [0, 0, 1, 1], [], []>} : vector<8x8xf32>, vector<8x128xf32>, vector<8x128xf32> -> vector<8x128xf32>
    %168 = arith.addf %167, %2 : vector<8x128xf32>
    %c2_96 = arith.constant 2 : index
    %c0_97 = arith.constant 0 : index
    %c0_98 = arith.constant 0 : index
    %169 = vector.load %arg3[%c2_96, %c0_97, %c0_98] : memref<3x8x128xf32, #tpu.memory_space<vmem>>, vector<1x8x128xf32>
    %170 = vector.shape_cast %169 : vector<1x8x128xf32> to vector<8x128xf32>
    %c4_i32 = arith.constant 4 : i32
    %171 = tpu.dynamic_rotate %168 by %c4_i32 dim 1 : vector<8x128xf32>, i32 -> vector<8x128xf32>
    %c4_i32_99 = arith.constant 4 : i32
    %172 = vector.broadcast %c4_i32_99 : i32 to vector<8x128xi32>
    %173 = arith.cmpi sge, %19, %172 : vector<8x128xi32>
    %174 = arith.andi %21, %173 : vector<8x128xi1>
    %c20_i32 = arith.constant 20 : i32
    %175 = vector.broadcast %c20_i32 : i32 to vector<8x128xi32>
    %176 = arith.cmpi slt, %19, %175 : vector<8x128xi32>
    %177 = arith.andi %174, %176 : vector<8x128xi1>
    %cst_100 = arith.constant 0.000000e+00 : f32
    %178 = vector.broadcast %cst_100 : f32 to vector<8x128xf32>
    %179 = arith.select %177, %171, %178 : vector<8x128xi1>, vector<8x128xf32>
    %c6 = arith.constant 6 : index
    %c0_101 = arith.constant 0 : index
    %c0_102 = arith.constant 0 : index
    %180 = vector.load %arg2[%c6, %c0_101, %c0_102] : memref<9x8x8xf32, #tpu.memory_space<vmem>>, vector<1x8x8xf32>
    %181 = vector.shape_cast %180 : vector<1x8x8xf32> to vector<8x8xf32>
    %cst_103 = arith.constant dense<0.000000e+00> : vector<8x128xf32>
    %182 = tpu.matmul %181, %179, %cst_103 {dimension_numbers = #tpu.dot_dimension_numbers<[1], [0], [0], [1], [0, 0, 1, 1], [], []>} : vector<8x8xf32>, vector<8x128xf32>, vector<8x128xf32> -> vector<8x128xf32>
    %183 = arith.addf %170, %182 : vector<8x128xf32>
    %c7 = arith.constant 7 : index
    %c0_104 = arith.constant 0 : index
    %c0_105 = arith.constant 0 : index
    %184 = vector.load %arg2[%c7, %c0_104, %c0_105] : memref<9x8x8xf32, #tpu.memory_space<vmem>>, vector<1x8x8xf32>
    %185 = vector.shape_cast %184 : vector<1x8x8xf32> to vector<8x8xf32>
    %cst_106 = arith.constant dense<0.000000e+00> : vector<8x128xf32>
    %186 = tpu.matmul %185, %168, %cst_106 {dimension_numbers = #tpu.dot_dimension_numbers<[1], [0], [0], [1], [0, 0, 1, 1], [], []>} : vector<8x8xf32>, vector<8x128xf32>, vector<8x128xf32> -> vector<8x128xf32>
    %187 = arith.addf %183, %186 : vector<8x128xf32>
    %c124_i32 = arith.constant 124 : i32
    %188 = tpu.dynamic_rotate %168 by %c124_i32 dim 1 : vector<8x128xf32>, i32 -> vector<8x128xf32>
    %c-4_i32 = arith.constant -4 : i32
    %189 = vector.broadcast %c-4_i32 : i32 to vector<8x128xi32>
    %190 = arith.cmpi sge, %19, %189 : vector<8x128xi32>
    %191 = arith.andi %21, %190 : vector<8x128xi1>
    %c12_i32 = arith.constant 12 : i32
    %192 = vector.broadcast %c12_i32 : i32 to vector<8x128xi32>
    %193 = arith.cmpi slt, %19, %192 : vector<8x128xi32>
    %194 = arith.andi %191, %193 : vector<8x128xi1>
    %cst_107 = arith.constant 0.000000e+00 : f32
    %195 = vector.broadcast %cst_107 : f32 to vector<8x128xf32>
    %196 = arith.select %194, %188, %195 : vector<8x128xi1>, vector<8x128xf32>
    %c8 = arith.constant 8 : index
    %c0_108 = arith.constant 0 : index
    %c0_109 = arith.constant 0 : index
    %197 = vector.load %arg2[%c8, %c0_108, %c0_109] : memref<9x8x8xf32, #tpu.memory_space<vmem>>, vector<1x8x8xf32>
    %198 = vector.shape_cast %197 : vector<1x8x8xf32> to vector<8x8xf32>
    %cst_110 = arith.constant dense<0.000000e+00> : vector<8x128xf32>
    %199 = tpu.matmul %198, %196, %cst_110 {dimension_numbers = #tpu.dot_dimension_numbers<[1], [0], [0], [1], [0, 0, 1, 1], [], []>} : vector<8x8xf32>, vector<8x128xf32>, vector<8x128xf32> -> vector<8x128xf32>
    %200 = arith.addf %187, %199 : vector<8x128xf32>
    %cst_111 = arith.constant 0.000000e+00 : f32
    %201 = vector.broadcast %cst_111 : f32 to vector<8x128xf32>
    %202 = arith.maximumf %200, %201 : vector<8x128xf32>
    %c2_112 = arith.constant 2 : index
    %c0_113 = arith.constant 0 : index
    %c0_114 = arith.constant 0 : index
    %203 = vector.load %arg5[%c2_112, %c0_113, %c0_114] : memref<3x8x128xf32, #tpu.memory_space<vmem>>, vector<1x8x128xf32>
    %204 = vector.shape_cast %203 : vector<1x8x128xf32> to vector<8x128xf32>
    %c4_i32_115 = arith.constant 4 : i32
    %205 = tpu.dynamic_rotate %202 by %c4_i32_115 dim 1 : vector<8x128xf32>, i32 -> vector<8x128xf32>
    %c4_i32_116 = arith.constant 4 : i32
    %206 = vector.broadcast %c4_i32_116 : i32 to vector<8x128xi32>
    %207 = arith.cmpi sge, %19, %206 : vector<8x128xi32>
    %208 = arith.andi %21, %207 : vector<8x128xi1>
    %c20_i32_117 = arith.constant 20 : i32
    %209 = vector.broadcast %c20_i32_117 : i32 to vector<8x128xi32>
    %210 = arith.cmpi slt, %19, %209 : vector<8x128xi32>
    %211 = arith.andi %208, %210 : vector<8x128xi1>
    %cst_118 = arith.constant 0.000000e+00 : f32
    %212 = vector.broadcast %cst_118 : f32 to vector<8x128xf32>
    %213 = arith.select %211, %205, %212 : vector<8x128xi1>, vector<8x128xf32>
    %c6_119 = arith.constant 6 : index
    %c0_120 = arith.constant 0 : index
    %c0_121 = arith.constant 0 : index
    %214 = vector.load %arg4[%c6_119, %c0_120, %c0_121] : memref<9x8x8xf32, #tpu.memory_space<vmem>>, vector<1x8x8xf32>
    %215 = vector.shape_cast %214 : vector<1x8x8xf32> to vector<8x8xf32>
    %cst_122 = arith.constant dense<0.000000e+00> : vector<8x128xf32>
    %216 = tpu.matmul %215, %213, %cst_122 {dimension_numbers = #tpu.dot_dimension_numbers<[1], [0], [0], [1], [0, 0, 1, 1], [], []>} : vector<8x8xf32>, vector<8x128xf32>, vector<8x128xf32> -> vector<8x128xf32>
    %217 = arith.addf %204, %216 : vector<8x128xf32>
    %c7_123 = arith.constant 7 : index
    %c0_124 = arith.constant 0 : index
    %c0_125 = arith.constant 0 : index
    %218 = vector.load %arg4[%c7_123, %c0_124, %c0_125] : memref<9x8x8xf32, #tpu.memory_space<vmem>>, vector<1x8x8xf32>
    %219 = vector.shape_cast %218 : vector<1x8x8xf32> to vector<8x8xf32>
    %cst_126 = arith.constant dense<0.000000e+00> : vector<8x128xf32>
    %220 = tpu.matmul %219, %202, %cst_126 {dimension_numbers = #tpu.dot_dimension_numbers<[1], [0], [0], [1], [0, 0, 1, 1], [], []>} : vector<8x8xf32>, vector<8x128xf32>, vector<8x128xf32> -> vector<8x128xf32>
    %221 = arith.addf %217, %220 : vector<8x128xf32>
    %c124_i32_127 = arith.constant 124 : i32
    %222 = tpu.dynamic_rotate %202 by %c124_i32_127 dim 1 : vector<8x128xf32>, i32 -> vector<8x128xf32>
    %c-4_i32_128 = arith.constant -4 : i32
    %223 = vector.broadcast %c-4_i32_128 : i32 to vector<8x128xi32>
    %224 = arith.cmpi sge, %19, %223 : vector<8x128xi32>
    %225 = arith.andi %21, %224 : vector<8x128xi1>
    %c12_i32_129 = arith.constant 12 : i32
    %226 = vector.broadcast %c12_i32_129 : i32 to vector<8x128xi32>
    %227 = arith.cmpi slt, %19, %226 : vector<8x128xi32>
    %228 = arith.andi %225, %227 : vector<8x128xi1>
    %cst_130 = arith.constant 0.000000e+00 : f32
    %229 = vector.broadcast %cst_130 : f32 to vector<8x128xf32>
    %230 = arith.select %228, %222, %229 : vector<8x128xi1>, vector<8x128xf32>
    %c8_131 = arith.constant 8 : index
    %c0_132 = arith.constant 0 : index
    %c0_133 = arith.constant 0 : index
    %231 = vector.load %arg4[%c8_131, %c0_132, %c0_133] : memref<9x8x8xf32, #tpu.memory_space<vmem>>, vector<1x8x8xf32>
    %232 = vector.shape_cast %231 : vector<1x8x8xf32> to vector<8x8xf32>
    %cst_134 = arith.constant dense<0.000000e+00> : vector<8x128xf32>
    %233 = tpu.matmul %232, %230, %cst_134 {dimension_numbers = #tpu.dot_dimension_numbers<[1], [0], [0], [1], [0, 0, 1, 1], [], []>} : vector<8x8xf32>, vector<8x128xf32>, vector<8x128xf32> -> vector<8x128xf32>
    %234 = arith.addf %221, %233 : vector<8x128xf32>
    %cst_135 = arith.constant 0.000000e+00 : f32
    %235 = vector.broadcast %cst_135 : f32 to vector<8x128xf32>
    %236 = arith.maximumf %234, %235 : vector<8x128xf32>
    %237 = arith.addf %236, %168 : vector<8x128xf32>
    %cst_136 = arith.constant 0.000000e+00 : f32
    %238 = vector.broadcast %cst_136 : f32 to vector<8x128xf32>
    %239 = arith.maximumf %237, %238 : vector<8x128xf32>
    %cst_137 = arith.constant dense<0.000000e+00> : vector<8x128xf32>
    %240 = tpu.matmul %239, %1, %cst_137 {dimension_numbers = #tpu.dot_dimension_numbers<[1], [0], [0], [1], [0, 0, 1, 1], [], []>} : vector<8x128xf32>, vector<128x128xf32>, vector<8x128xf32> -> vector<8x128xf32>
    %c1_138 = arith.constant 1 : index
    %c0_139 = arith.constant 0 : index
    %c0_140 = arith.constant 0 : index
    %241 = vector.load %arg8[%c1_138, %c0_139, %c0_140] : memref<2x8x8xf32, #tpu.memory_space<vmem>>, vector<1x8x8xf32>
    %242 = vector.shape_cast %241 : vector<1x8x8xf32> to vector<8x8xf32>
    %cst_141 = arith.constant dense<0.000000e+00> : vector<8x128xf32>
    %243 = tpu.matmul %242, %240, %cst_141 {dimension_numbers = #tpu.dot_dimension_numbers<[1], [0], [0], [1], [0, 0, 1, 1], [], []>} : vector<8x8xf32>, vector<8x128xf32>, vector<8x128xf32> -> vector<8x128xf32>
    %244 = arith.addf %243, %2 : vector<8x128xf32>
    %c0_142 = arith.constant 0 : index
    %c0_143 = arith.constant 0 : index
    %245 = vector.load %arg9[%c0_142, %c0_143] : memref<8x128xf32, #tpu.memory_space<vmem>>, vector<8x128xf32>
    tpu.vector_store %arg9[%c0_142, %c0_143], %244 {strides = array<i32>} : memref<8x128xf32, #tpu.memory_space<vmem>>, vector<8x128xf32>,
    return
  }
  func.func @transform_0(%arg0: i32) -> (i32, i32) {
    %c0_i32 = arith.constant 0 : i32
    %c0_i32_0 = arith.constant 0 : i32
    %c0_i32_1 = arith.constant 0 : i32
    return %c0_i32, %c0_i32_0 : i32, i32
  }
  func.func @transform_1(%arg0: i32) -> (i32, i32, i32) {
    %c0_i32 = arith.constant 0 : i32
    %c0_i32_0 = arith.constant 0 : i32
    %c0_i32_1 = arith.constant 0 : i32
    %c0_i32_2 = arith.constant 0 : i32
    return %c0_i32, %c0_i32_0, %c0_i32_1 : i32, i32, i32
  }
  func.func @transform_2(%arg0: i32) -> (i32, i32, i32) {
    %c0_i32 = arith.constant 0 : i32
    %c0_i32_0 = arith.constant 0 : i32
    %c0_i32_1 = arith.constant 0 : i32
    %c0_i32_2 = arith.constant 0 : i32
    return %c0_i32, %c0_i32_0, %c0_i32_1 : i32, i32, i32
  }
  func.func @transform_3(%arg0: i32) -> (i32, i32, i32) {
    %c0_i32 = arith.constant 0 : i32
    %c0_i32_0 = arith.constant 0 : i32
    %c0_i32_1 = arith.constant 0 : i32
    %c0_i32_2 = arith.constant 0 : i32
    return %c0_i32, %c0_i32_0, %c0_i32_1 : i32, i32, i32
  }
  func.func @transform_4(%arg0: i32) -> (i32, i32, i32) {
    %c0_i32 = arith.constant 0 : i32
    %c0_i32_0 = arith.constant 0 : i32
    %c0_i32_1 = arith.constant 0 : i32
    %c0_i32_2 = arith.constant 0 : i32
    return %c0_i32, %c0_i32_0, %c0_i32_1 : i32, i32, i32
  }
  func.func @transform_5(%arg0: i32) -> (i32, i32) {
    %c0_i32 = arith.constant 0 : i32
    %c0_i32_0 = arith.constant 0 : i32
    %c0_i32_1 = arith.constant 0 : i32
    return %c0_i32, %c0_i32_0 : i32, i32
  }
  func.func @transform_6(%arg0: i32) -> (i32, i32) {
    %c0_i32 = arith.constant 0 : i32
    %c0_i32_0 = arith.constant 0 : i32
    %c0_i32_1 = arith.constant 0 : i32
    return %c0_i32, %c0_i32_0 : i32, i32
  }
  func.func @transform_7(%arg0: i32) -> (i32, i32, i32) {
    %c0_i32 = arith.constant 0 : i32
    %c0_i32_0 = arith.constant 0 : i32
    %c0_i32_1 = arith.constant 0 : i32
    %c0_i32_2 = arith.constant 0 : i32
    return %c0_i32, %c0_i32_0, %c0_i32_1 : i32, i32, i32
  }
  func.func @transform_8(%arg0: i32) -> (i32, i32) {
    %c0_i32 = arith.constant 0 : i32
    %c0_i32_0 = arith.constant 0 : i32
    %c0_i32_1 = arith.constant 0 : i32
    return %c0_i32, %c0_i32_0 : i32, i32
  }
}

</mosaic_0001>

<bundles_post_ra>
// kernel: gta_forward.1
= control target key start
LH: loop header
LB: loop body
LE: loop exit
PB: predicated region body
PF: predicated region fallthrough
CT: control target
= control target key end

     0   :  { %v2189_v1 = vmov 0.0   ;;  %vm2190_vm0 = vmmov 0   ;;  %s2191_s29 = smov 1   ;;  %s2192_s30 = smov 127   ;;  %v47_v2 = vlaneseq  ;;  %vm71_vm4 = vcmask 64512   ;;  %s2608_s0 = inlined_call_operand.vmem [shape: f32[8,128], index: 0, kind: input, shape index: {}]   ;;  %s2609_s1 = inlined_call_operand.vmem [shape: f32[9,8,8], index: 1, kind: input, shape index: {}]   ;;  %s2610_s2 = inlined_call_operand.vmem [shape: f32[3,8,128], index: 2, kind: input, shape index: {}]   ;;  %s2611_s3 = inlined_call_operand.vmem [shape: f32[9,8,8], index: 3, kind: input, shape index: {}]   ;;  %s2612_s4 = inlined_call_operand.vmem [shape: f32[3,8,128], index: 4, kind: input, shape index: {}]   ;;  %s2613_s5 = inlined_call_operand.vmem [shape: f32[128,128], index: 5, kind: input, shape index: {}]   ;;  %s2614_s7 = inlined_call_operand.vmem [shape: f32[2,8,8], index: 7, kind: input, shape index: {}]   ;;  %s2615_s6 = inlined_call_operand.vmem [shape: f32[8,128], index: 6, kind: input, shape index: {}]   ;;  %s2616_s8 = inlined_call_operand.vmem [shape: f32[8,128], index: 8, kind: output, shape index: {}]  }
   0x1   :  { %v2246_v0 = vld [vmem:[%s2608_s0] sm:$0xff]  ;;  %1932 = vmatprep.subr.mxu0 %v2189_v1  ;;  %1934 = vmatprep.mubr.msk.f32.mxu0 %vm2190_vm0, %v2189_v1  ;;  %v1807_v8 = vld [vmem:[%s2609_s1 + $0x8] sm:$0xff]  ;;  %v1809_v11 = vld [vmem:[%s2609_s1 + $0x10] sm:$0xff]  ;;  %s2193_s24 = smov 126   ;;  %s2194_s25 = smov 2   ;;  %v2195_v41 = vmov 0.0|0.0  }
   0x2   :  { %63 = vrot.lane.b32.xlu0 %v2246_v0, %s2191_s29  ;;  %1977 = vmatprep.subr.mxu1 %v2189_v1  ;;  %v2258_v3 = vand.u32 127, %v47_v2  ;;  %v70_v6 = vld [vmem:[%s2609_s1] sm:$0xff]  ;;  %v1814_v19 = vld [vmem:[%s2611_s3 + $0x8] sm:$0xff]  ;;  %v1816_v21 = vld [vmem:[%s2611_s3 + $0x10] sm:$0xff]  ;;  %s2196_s0 = smov 124   ;;  %s2197_s9 = smov 4  }
   0x3   :  { %1979 = vmatprep.mubr.msk.f32.mxu1 %vm2190_vm0, %v2189_v1  ;;  %v62_v12 = vld [vmem:[%s2610_s2] sm:$0xff]  ;;  %v1820_v30 = vld [vmem:[%s2609_s1 + $0x18] sm:$0xff]  ;;  %v1825_v35 = vld [vmem:[%s2609_s1 + $0x28] sm:$0xff] }
   0x4   :  { %v2261_v4 = vand.u32 15, %v2258_v3  ;;  %vm61_vm1 = vcmp.lt.s32.totalorder %v2258_v3, 32  ;;  %v310_v17 = vld [vmem:[%s2611_s3] sm:$0xff]  ;;  %v1819_v36 = vld [vmem:[%s2610_s2 + $0x8] sm:$0xff]  ;;  %v32_v44 = vld [vmem:[%s2613_s5 + $0x10] sm:$0xff] }
   0x5   :  { %v306_v22 = vld [vmem:[%s2612_s4] sm:$0xff]  ;;  %v31_v43 = vld [vmem:[%s2613_s5 + $0x8] sm:$0xff]  ;;  %v33_v46 = vld [vmem:[%s2613_s5 + $0x18] sm:$0xff] }
   0x6   :  { %222 = vrot.lane.b32.xlu0 %v2246_v0, %s2192_s30  ;;  %vm65_vm2 = vcmp.ge.s32.totalorder %v2261_v4, 1  ;;  %vm226_vm5 = vcmp.lt.s32.totalorder %v2261_v4, 15  ;;  %vm547_vm7 = vcmp.ge.s32.totalorder %v2261_v4, 2  ;;  %vm708_vm9 = vcmp.lt.s32.totalorder %v2261_v4, 14  ;;  %v1823_v32 = vld [vmem:[%s2609_s1 + $0x20] sm:$0xff]  ;;  %v35_v49 = vld [vmem:[%s2613_s5 + $0x28] sm:$0xff] }
   0x7   :  { %vm2267_vm3 = vmand %vm61_vm1, %vm65_vm2  ;;  %v30_v42 = vld [vmem:[%s2613_s5] sm:$0xff]  ;;  %v2400_v47 = vpack.c.bf16 %v33_v46, %v32_v44  ;;  %v36_v51 = vld [vmem:[%s2613_s5 + $0x30] sm:$0xff]  ;;  %vm1175_vm11 = vcmp.ge.s32.totalorder %v2261_v4, 4  ;;  %vm1336_vm13 = vcmp.lt.s32.totalorder %v2261_v4, 12 }
   0x8   :  { %vm2288_vm6 = vmand %vm61_vm1, %vm226_vm5  ;;  %v2394_v45 = vpack.c.bf16 %v31_v43, %v30_v42  ;;  %v34_v48 = vld [vmem:[%s2613_s5 + $0x20] sm:$0xff]  ;;  %v37_v52 = vld [vmem:[%s2613_s5 + $0x38] sm:$0xff] }
   0x9   :  { %vm2345_vm8 = vmand %vm61_vm1, %vm547_vm7  ;;  %v2410_v50 = vpack.c.bf16 %v35_v49, %v34_v48  ;;  %v2420_v53 = vpack.c.bf16 %v37_v52, %v36_v51  ;;  %v38_v54 = vld [vmem:[%s2613_s5 + $0x40] sm:$0xff]  ;;  %v39_v55 = vld [vmem:[%s2613_s5 + $0x48] sm:$0xff] }
   0xa   :  { %vm2366_vm10 = vmand %vm61_vm1, %vm708_vm9  ;;  %v2430_v56 = vpack.c.bf16 %v39_v55, %v38_v54  ;;  %v40_v57 = vld [vmem:[%s2613_s5 + $0x50] sm:$0xff]  ;;  %v41_v58 = vld [vmem:[%s2613_s5 + $0x58] sm:$0xff] }
   0xb   :  { %v2440_v59 = vpack.c.bf16 %v41_v58, %v40_v57  ;;  %v1829_v60 = vld [vmem:[%s2611_s3 + $0x18] sm:$0xff]  ;;  %v1832_v62 = vld [vmem:[%s2611_s3 + $0x20] sm:$0xff]  ;;  %v43_v5 = vld [vmem:[%s2613_s5 + $0x68] sm:$0xff] }
   0xc   :  { %v42_v2 = vld [vmem:[%s2613_s5 + $0x60] sm:$0xff]  ;;  %v1828_v10 = vld [vmem:[%s2612_s4 + $0x8] sm:$0xff]  ;;  %vm2516_vm12 = vmand %vm61_vm1, %vm1175_vm11 }
   0xd   :  { %vm2537_vm14 = vmand %vm61_vm1, %vm1336_vm13  ;;  %v1844_v4 = vld [vmem:[%s2609_s1 + $0x40] sm:$0xff]  ;;  %v1838_v3 = vld [vmem:[%s2610_s2 + $0x10] sm:$0xff] }
   0xe   :  { %v1856_v46 = vld [vmem:[%s2614_s7 + $0x8] sm:$0xff] }
  0x74   :  { %v64_v7 = vpop.permute.xlu0 %63 }
  0x75   :  { %1933 = vmatpush3.msk.msra.mxu0 %vm2267_vm3, %v64_v7  ;;  %v44_v7 = vld [vmem:[%s2613_s5 + $0x70] sm:$0xff] }
  0x76   :  { %1935 = vmatmul.mubr.msk.f32.vlgmr.msra.gmra.mrb[0].mxu0 %vm71_vm4, %v70_v6  ;;  %1937 = vmatprep.subr.mxu0 %v2189_v1  ;;  %v2476_v6 = vpack.c.bf16 %v43_v5, %v42_v2 }
  0x77   :  { %1938 = vmatpush3.msra.mxu0 %v2246_v0  ;;  %1939 = vmatprep.mubr.msk.f32.mxu0 %vm2190_vm0, %v2189_v1 }
  0x78   :  { %1942 = vmatprep.subr.mxu0 %v2189_v1  ;;  %v223_v9 = vpop.permute.xlu0 %222 }
  0x7e   :  { %1940 = vmatmul.mubr.msk.f32.vlgmr.msra.gmra.mrb[0].mxu0 %vm71_vm4, %v1807_v8  ;;  %v45_v8 = vld [vmem:[%s2613_s5 + $0x78] sm:$0xff] }
  0x7f   :  { %1943 = vmatpush3.msk.msra.mxu0 %vm2288_vm6, %v223_v9  ;;  %1944 = vmatprep.mubr.msk.f32.mxu0 %vm2190_vm0, %v2189_v1  ;;  %v2486_v9 = vpack.c.bf16 %v45_v8, %v44_v7 }
  0x80   :  { %1947 = vmatprep.subr.mxu0 %v2189_v1 }
  0x86   :  { %1945 = vmatmul.mubr.msk.f32.vlgmr.msra.gmra.mrb[0].mxu0 %vm71_vm4, %v1809_v11 }
  0x87   :  { %1949 = vmatprep.mubr.msk.f32.mxu0 %vm2190_vm0, %v2189_v1 }
 0x159   :  { %v300_v13 = vpop.f32.mrb[0].mxu0 }
 0x15a   :  { %v2150_v14 = vadd.f32 %v300_v13, %v62_v12  ;;  %v1946_v15 = vpop.f32.mrb[1].mxu0 }
 0x15c   :  { %v305_v16 = vmax.f32 %v2150_v14, 0.0 }
 0x15e   :  { %307 = vrot.lane.b32.xlu1 %v305_v16, %s2191_s29 }
 0x162   :  { %461 = vrot.lane.b32.xlu1 %v305_v16, %s2192_s30 }
 0x1d0   :  { %v308_v18 = vpop.permute.xlu1 %307 }
 0x1d1   :  { %1948 = vmatpush3.msk.msra.mxu0 %vm2267_vm3, %v308_v18 }
 0x1d2   :  { %1950 = vmatmul.mubr.msk.f32.vlgmr.msra.gmra.mrb[2].mxu0 %vm71_vm4, %v310_v17  ;;  %1952 = vmatprep.subr.mxu0 %v2189_v1  ;;  %v1097_v17 = vld [vmem:[%s2614_s7] sm:$0xff] }
 0x1d3   :  { %1953 = vmatpush3.msra.mxu0 %v305_v16  ;;  %1954 = vmatprep.mubr.msk.f32.mxu0 %vm2190_vm0, %v2189_v1 }
 0x1d4   :  { %1957 = vmatprep.subr.mxu0 %v2189_v1  ;;  %v462_v20 = vpop.permute.xlu1 %461 }
 0x1da   :  { %1955 = vmatmul.mubr.msk.f32.vlgmr.msra.gmra.mrb[2].mxu0 %vm71_vm4, %v1814_v19 }
 0x1db   :  { %1958 = vmatpush3.msk.msra.mxu0 %vm2288_vm6, %v462_v20  ;;  %1959 = vmatprep.mubr.msk.f32.mxu0 %vm2190_vm0, %v2189_v1  ;;  %v2506_v20 = vld [vmem:[%s2615_s6] sm:$0xff] }
 0x1dc   :  { %1962 = vmatprep.subr.mxu0 %v2189_v1 }
 0x1e2   :  { %1960 = vmatmul.mubr.msk.f32.vlgmr.msra.gmra.mrb[2].mxu0 %vm71_vm4, %v1816_v21 }
 0x1e3   :  { %1964 = vmatprep.mubr.msk.f32.mxu0 %vm2190_vm0, %v2189_v1 }
 0x2b5   :  { %v535_v23 = vpop.f32.mrb[2].mxu0 }
 0x2b6   :  { %v2151_v24 = vadd.f32 %v535_v23, %v306_v22  ;;  %v1961_v25 = vpop.f32.mrb[3].mxu0 }
 0x2b7   :  { %v1839_v25 = vld [vmem:[%s2609_s1 + $0x30] sm:$0xff] }
 0x2b8   :  { %v540_v26 = vmax.f32 %v2151_v24, 0.0 }
 0x2ba   :  { %v541_v27 = vadd.f32 %v540_v26, %v2246_v0  ;;  %v1834_v0 = vld [vmem:[%s2611_s3 + $0x28] sm:$0xff] }
 0x2bc   :  { %v2338_v28 = vmax.f32 %v541_v27, 0.0  ;;  %v1842_v27 = vld [vmem:[%s2609_s1 + $0x38] sm:$0xff] }
 0x2be   :  { %704 = vrot.lane.b32.xlu1 %v2338_v28, %s2193_s24  ;;  %545 = vrot.lane.b32.xlu0 %v2338_v28, %s2194_s25 }
 0x330   :  { %v546_v31 = vpop.permute.xlu0 %545  ;;  %v705_v34 = vpop.permute.xlu1 %704 }
 0x331   :  { %1963 = vmatpush3.msk.msra.mxu0 %vm2345_vm8, %v546_v31 }
 0x332   :  { %1965 = vmatmul.mubr.msk.f32.vlgmr.msra.gmra.mrb[4].mxu0 %vm71_vm4, %v1820_v30  ;;  %1967 = vmatprep.subr.mxu0 %v2189_v1 }
 0x333   :  { %1968 = vmatpush3.msra.mxu0 %v2338_v28  ;;  %1969 = vmatprep.mubr.msk.f32.mxu0 %vm2190_vm0, %v2189_v1 }
 0x334   :  { %1972 = vmatprep.subr.mxu0 %v2189_v1 }
 0x33a   :  { %1970 = vmatmul.mubr.msk.f32.vlgmr.msra.gmra.mrb[4].mxu0 %vm71_vm4, %v1823_v32 }
 0x33b   :  { %1973 = vmatpush3.msk.msra.mxu0 %vm2366_vm10, %v705_v34  ;;  %1974 = vmatprep.mubr.msk.f32.mxu0 %vm2190_vm0, %v2189_v1  ;;  %v1848_v34 = vld [vmem:[%s2611_s3 + $0x30] sm:$0xff] }
 0x33c   :  { %2102 = vmatprep.subr.bf16.mxu0 %v2195_v41 }
 0x342   :  { %1975 = vmatmul.mubr.msk.f32.vlgmr.msra.gmra.mrb[4].mxu0 %vm71_vm4, %v1825_v35 }
 0x343   :  { %2024 = vmatprep.mubr.msk.f32.mxu0 %vm2190_vm0, %v2189_v1  ;;  %2104 = vmatpush3.bf16.msra.mxu0 %v2394_v45 }
 0x344   :  { %2105 = vmatprep.subr.bf16.mxu0 %v2195_v41 }
 0x347   :  { %2107 = vmatpush3.bf16.msra.mxu0 %v2400_v47 }
 0x348   :  { %2108 = vmatprep.subr.bf16.mxu0 %v2195_v41 }
 0x34b   :  { %2110 = vmatpush3.bf16.msra.mxu0 %v2410_v50 }
 0x34c   :  { %2111 = vmatprep.subr.bf16.mxu0 %v2195_v41 }
 0x34f   :  { %2113 = vmatpush3.bf16.msra.mxu0 %v2420_v53 }
 0x350   :  { %2114 = vmatprep.subr.bf16.mxu0 %v2195_v41 }
 0x353   :  { %2116 = vmatpush3.bf16.msra.mxu0 %v2430_v56 }
 0x354   :  { %2117 = vmatprep.subr.bf16.mxu0 %v2195_v41 }
 0x357   :  { %2119 = vmatpush3.bf16.msra.mxu0 %v2440_v59 }
 0x358   :  { %2120 = vmatprep.subr.bf16.mxu0 %v2195_v41 }
 0x35b   :  { %2122 = vmatpush3.bf16.msra.mxu0 %v2476_v6 }
 0x35c   :  { %2123 = vmatprep.subr.bf16.mxu0 %v2195_v41 }
 0x35f   :  { %2125 = vmatpush3.bf16.msra.mxu0 %v2486_v9 }
 0x360   :  { %2097 = vmatprep.subr.mxu0 %v2189_v1 }
 0x415   :  { %v782_v37 = vpop.f32.mrb[4].mxu0 }
 0x416   :  { %v2152_v38 = vadd.f32 %v1819_v36, %v782_v37  ;;  %v1976_v39 = vpop.f32.mrb[5].mxu0  ;;  %v1851_v36 = vld [vmem:[%s2611_s3 + $0x38] sm:$0xff] }
 0x418   :  { %v787_v40 = vmax.f32 %v2152_v38, 0.0  ;;  %v1853_v38 = vld [vmem:[%s2611_s3 + $0x40] sm:$0xff] }
 0x41a   :  { %945 = vrot.lane.b32.xlu1 %v787_v40, %s2193_s24  ;;  %790 = vrot.lane.b32.xlu0 %v787_v40, %s2194_s25 }
 0x48c   :  { %v791_v61 = vpop.permute.xlu0 %790  ;;  %v946_v63 = vpop.permute.xlu1 %945 }
 0x48d   :  { %1978 = vmatpush3.msk.msra.mxu1 %vm2345_vm8, %v791_v61 }
 0x48e   :  { %1980 = vmatmul.mubr.msk.f32.vlgmr.msra.gmra.mrb[0].mxu1 %vm71_vm4, %v1829_v60  ;;  %1982 = vmatprep.subr.mxu1 %v2189_v1 }
 0x48f   :  { %1983 = vmatpush3.msra.mxu1 %v787_v40  ;;  %1984 = vmatprep.mubr.msk.f32.mxu1 %vm2190_vm0, %v2189_v1 }
 0x490   :  { %1987 = vmatprep.subr.mxu1 %v2189_v1 }
 0x496   :  { %1985 = vmatmul.mubr.msk.f32.vlgmr.msra.gmra.mrb[0].mxu1 %vm71_vm4, %v1832_v62 }
 0x497   :  { %1988 = vmatpush3.msk.msra.mxu1 %vm2366_vm10, %v946_v63  ;;  %1989 = vmatprep.mubr.msk.f32.mxu1 %vm2190_vm0, %v2189_v1 }
 0x498   :  { %2027 = vmatprep.subr.mxu1 %v2189_v1 }
 0x49e   :  { %1990 = vmatmul.mubr.msk.f32.vlgmr.msra.gmra.mrb[0].mxu1 %vm71_vm4, %v1834_v0 }
 0x49f   :  { %2029 = vmatprep.mubr.msk.f32.mxu1 %vm2190_vm0, %v2189_v1 }
 0x571   :  { %v1019_v11 = vpop.f32.mrb[0].mxu1 }
 0x572   :  { %v2153_v12 = vadd.f32 %v1828_v10, %v1019_v11  ;;  %v1991_v13 = vpop.f32.mrb[1].mxu1 }
 0x574   :  { %v1024_v14 = vmax.f32 %v2153_v12, 0.0 }
 0x576   :  { %v1025_v15 = vadd.f32 %v1024_v14, %v2338_v28 }
 0x578   :  { %v1026_v16 = vmax.f32 %v1025_v15, 0.0 }
 0x57a   :  { %2025 = vmatmul.mubr.f32.vlgmr.msra.gmra.mrb[6].mxu0 %v1026_v16 }
 0x57b   :  { %2099 = vmatprep.mubr.msk.f32.mxu0 %vm2190_vm0, %v2189_v1 }
 0x64d   :  { %v1093_v18 = vpop.f32.mrb[6].mxu0 }
 0x64e   :  { %v2026_v19 = vpop.f32.mrb[7].mxu0  ;;  %2028 = vmatpush3.msra.mxu1 %v1093_v18 }
 0x64f   :  { %2030 = vmatmul.mubr.msk.f32.vlgmr.msra.gmra.mrb[2].mxu1 %vm71_vm4, %v1097_v17  ;;  %2032 = vmatprep.subr.mxu1 %v2189_v1 }
 0x650   :  { %2034 = vmatprep.mubr.msk.f32.mxu1 %vm2190_vm0, %v2189_v1 }
 0x722   :  { %v1167_v21 = vpop.f32.mrb[2].mxu1 }
 0x723   :  { %v2509_v22 = vadd.f32 %v1167_v21, %v2506_v20  ;;  %v2031_v23 = vpop.f32.mrb[3].mxu1 }
 0x725   :  { %1332 = vrot.lane.b32.xlu1 %v2509_v22, %s2196_s0  ;;  %1173 = vrot.lane.b32.xlu0 %v2509_v22, %s2197_s9 }
 0x797   :  { %v1174_v26 = vpop.permute.xlu0 %1173  ;;  %v1333_v29 = vpop.permute.xlu1 %1332 }
 0x798   :  { %2033 = vmatpush3.msk.msra.mxu1 %vm2516_vm12, %v1174_v26 }
 0x799   :  { %2035 = vmatmul.mubr.msk.f32.vlgmr.msra.gmra.mrb[4].mxu1 %vm71_vm4, %v1839_v25  ;;  %2037 = vmatprep.subr.mxu1 %v2189_v1 }
 0x79a   :  { %2038 = vmatpush3.msra.mxu1 %v2509_v22  ;;  %2039 = vmatprep.mubr.msk.f32.mxu1 %vm2190_vm0, %v2189_v1 }
 0x79b   :  { %2042 = vmatprep.subr.mxu1 %v2189_v1 }
 0x7a1   :  { %2040 = vmatmul.mubr.msk.f32.vlgmr.msra.gmra.mrb[4].mxu1 %vm71_vm4, %v1842_v27 }
 0x7a2   :  { %2043 = vmatpush3.msk.msra.mxu1 %vm2537_vm14, %v1333_v29  ;;  %2044 = vmatprep.mubr.msk.f32.mxu1 %vm2190_vm0, %v2189_v1 }
 0x7a3   :  { %2047 = vmatprep.subr.mxu1 %v2189_v1 }
 0x7a9   :  { %2045 = vmatmul.mubr.msk.f32.vlgmr.msra.gmra.mrb[4].mxu1 %vm71_vm4, %v1844_v4 }
 0x7aa   :  { %2049 = vmatprep.mubr.msk.f32.mxu1 %vm2190_vm0, %v2189_v1 }
 0x87c   :  { %v1410_v30 = vpop.f32.mrb[4].mxu1 }
 0x87d   :  { %v2154_v31 = vadd.f32 %v1838_v3, %v1410_v30  ;;  %v2046_v32 = vpop.f32.mrb[5].mxu1 }
 0x87f   :  { %v1415_v33 = vmax.f32 %v2154_v31, 0.0 }
 0x881   :  { %1573 = vrot.lane.b32.xlu1 %v1415_v33, %s2196_s0  ;;  %1418 = vrot.lane.b32.xlu0 %v1415_v33, %s2197_s9 }
 0x8f3   :  { %v1419_v35 = vpop.permute.xlu0 %1418  ;;  %v1574_v37 = vpop.permute.xlu1 %1573 }
 0x8f4   :  { %2048 = vmatpush3.msk.msra.mxu1 %vm2516_vm12, %v1419_v35 }
 0x8f5   :  { %2050 = vmatmul.mubr.msk.f32.vlgmr.msra.gmra.mrb[6].mxu1 %vm71_vm4, %v1848_v34  ;;  %2052 = vmatprep.subr.mxu1 %v2189_v1 }
 0x8f6   :  { %2053 = vmatpush3.msra.mxu1 %v1415_v33  ;;  %2054 = vmatprep.mubr.msk.f32.mxu1 %vm2190_vm0, %v2189_v1 }
 0x8f7   :  { %2057 = vmatprep.subr.mxu1 %v2189_v1 }
 0x8fd   :  { %2055 = vmatmul.mubr.msk.f32.vlgmr.msra.gmra.mrb[6].mxu1 %vm71_vm4, %v1851_v36 }
 0x8fe   :  { %2058 = vmatpush3.msk.msra.mxu1 %vm2537_vm14, %v1574_v37  ;;  %2059 = vmatprep.mubr.msk.f32.mxu1 %vm2190_vm0, %v2189_v1 }
 0x8ff   :  { %2126 = vmatprep.subr.bf16.mxu1 %v2195_v41 }
 0x905   :  { %2060 = vmatmul.mubr.msk.f32.vlgmr.msra.gmra.mrb[6].mxu1 %vm71_vm4, %v1853_v38 }
 0x906   :  { %2128 = vmatpush3.bf16.msra.mxu1 %v2394_v45  ;;  %2094 = vmatprep.mubr.msk.f32.mxu1 %vm2190_vm0, %v2189_v1  ;;  %v1847_v1 = vld [vmem:[%s2612_s4 + $0x10] sm:$0xff] }
 0x907   :  { %2129 = vmatprep.subr.bf16.mxu1 %v2195_v41 }
 0x90a   :  { %2131 = vmatpush3.bf16.msra.mxu1 %v2400_v47 }
 0x90b   :  { %2132 = vmatprep.subr.bf16.mxu1 %v2195_v41 }
 0x90e   :  { %2134 = vmatpush3.bf16.msra.mxu1 %v2410_v50 }
 0x90f   :  { %2135 = vmatprep.subr.bf16.mxu1 %v2195_v41 }
 0x912   :  { %2137 = vmatpush3.bf16.msra.mxu1 %v2420_v53 }
 0x913   :  { %2138 = vmatprep.subr.bf16.mxu1 %v2195_v41 }
 0x916   :  { %2140 = vmatpush3.bf16.msra.mxu1 %v2430_v56 }
 0x917   :  { %2141 = vmatprep.subr.bf16.mxu1 %v2195_v41 }
 0x91a   :  { %2143 = vmatpush3.bf16.msra.mxu1 %v2440_v59 }
 0x91b   :  { %2144 = vmatprep.subr.bf16.mxu1 %v2195_v41 }
 0x91e   :  { %2146 = vmatpush3.bf16.msra.mxu1 %v2476_v6 }
 0x91f   :  { %2147 = vmatprep.subr.bf16.mxu1 %v2195_v41 }
 0x922   :  { %2149 = vmatpush3.bf16.msra.mxu1 %v2486_v9 }
 0x9d8   :  { %v1647_v39 = vpop.f32.mrb[6].mxu1 }
 0x9d9   :  { %v2155_v40 = vadd.f32 %v1847_v1, %v1647_v39  ;;  %v2061_v42 = vpop.f32.mrb[7].mxu1 }
 0x9db   :  { %v1652_v43 = vmax.f32 %v2155_v40, 0.0 }
 0x9dd   :  { %v1653_v44 = vadd.f32 %v1652_v43, %v2509_v22 }
 0x9df   :  { %v1654_v45 = vmax.f32 %v1653_v44, 0.0 }
 0x9e1   :  { %2095 = vmatmul.mubr.f32.vlgmr.msra.gmra.mrb[8].mxu1 %v1654_v45 }
 0xab4   :  { %v1721_v47 = vpop.f32.mrb[8].mxu1 }
 0xab5   :  { %v2096_v41 = vpop.f32.mrb[9].mxu1  ;;  %2098 = vmatpush3.msra.mxu0 %v1721_v47 }
 0xab6   :  { %2100 = vmatmul.mubr.msk.f32.vlgmr.msra.gmra.mrb[8].mxu0 %vm71_vm4, %v1856_v46 }
 0xb89   :  { %v1796_v48 = vpop.f32.mrb[8].mxu0 }
 0xb8a   :  { %v1797_v49 = vadd.f32 %v1796_v48, %v2506_v20  ;;  %v2101_v50 = vpop.f32.mrb[9].mxu0 }
 0xb8c   :  { %1800 = vst [vmem:[%s2616_s8] sm:$0xff] %v1797_v49 }

</bundles_post_ra>
